<compile_context>
chip_gen: v5e
topology: v5e:2x2
jax: 0.10.0
libtpu: 0.0.40
codegen_flags: <defaults>
</compile_context>

<pallas_src>
import functools

import jax
import jax.numpy as jnp
from jax.experimental import pallas as pl
from jax.experimental.pallas import tpu as pltpu


# --------------------------------------------------------------------------- #
# Kernels
# --------------------------------------------------------------------------- #
def _fh_kernel_single_k(x_ref, w_ref, b_ref, o_ref):
    # Whole K reduction in one MXU call: no accumulator scratch, no branches.
    acc = jnp.dot(x_ref[...], w_ref[...], preferred_element_type=jnp.float32)
    # dropout: inference mode -> identity.
    # TODO(synk): training-mode dropout (head_dropout > 0) not implemented.
    o_ref[...] = (acc + b_ref[...].astype(jnp.float32)).astype(o_ref.dtype)


def _fh_kernel_multi_k(x_ref, w_ref, b_ref, o_ref, acc_ref):
    k = pl.program_id(2)

    @pl.when(k == 0)
    def _():
        acc_ref[...] = jnp.zeros_like(acc_ref)

    acc_ref[...] += jnp.dot(x_ref[...], w_ref[...],
                            preferred_element_type=jnp.float32)

    @pl.when(k == pl.num_programs(2) - 1)
    def _():
        # dropout: inference mode -> identity.
        o_ref[...] = (acc_ref[...] + b_ref[...].astype(jnp.float32)
                      ).astype(o_ref.dtype)


# --------------------------------------------------------------------------- #
# Helpers
# --------------------------------------------------------------------------- #
def _round_up(x, m):
    return (x + m - 1) // m * m


def _sublane(dtype):
    # f32 -> 8, bf16/f16 -> 16, int8/fp8 -> 32 (sub-32-bit packs along sublane)
    return {4: 8, 2: 16, 1: 32}.get(jnp.dtype(dtype).itemsize, 8)


def _largest_tile(total, unit, cap):
    """Largest multiple of `unit` that divides `total` and is <= cap."""
    cap = min(cap, total)
    best = unit
    t = unit
    while t <= cap:
        if total % t == 0:
            best = t
        t += unit
    return best


def _tpu_generation():
    try:
        kind = jax.devices()[0].device_kind.lower()
    except Exception:
        return None
    for tag in ("v7", "v6", "v5"):
        if tag in kind:
            return tag
    return None


def _weight_spec_multi_k(tk, tn):
    idx = lambda i, j, k: (k, j)
    try:
        # 3-deep buffering on the dominant (weight) stream: per-tile compute is
        # tiny when M is small, so the extra buffer hides weight-DMA latency.
        return pl.BlockSpec((tk, tn), idx, pipeline_mode=pl.Buffered(3))
    except (TypeError, AttributeError):
        # Older jax without pipeline_mode: fall back to plain double buffering.
        return pl.BlockSpec((tk, tn), idx)


# --------------------------------------------------------------------------- #
# One-time parameter preparation (call at model init, NOT per forward)
# --------------------------------------------------------------------------- #
def prepare_head_params(weight, bias, *, param_dtype=None):
    """Transpose nn.Linear weight to (K, N), pad to (8,128)-friendly shapes.

    weight: (pred_len, head_nf)  -- PyTorch nn.Linear layout
    bias:   (pred_len,)
    param_dtype: optional streaming dtype for the weight (e.g. jnp.bfloat16
        halves the dominant HBM traffic; minor precision trade-off -- f32
        accumulation is kept either way).
    Returns (w_padded (Kp, Np), bias_padded (1, Np) f32, head_nf, pred_len).
    """
    pred_len, head_nf = weight.shape
    dt = weight.dtype if param_dtype is None else jnp.dtype(param_dtype)
    Kp = _round_up(head_nf, 128)
    Np = _round_up(pred_len, 128)
    w_p = jnp.zeros((Kp, Np), dt).at[:head_nf, :pred_len].set(
        weight.T.astype(dt))
    b_p = jnp.zeros((1, Np), jnp.float32).at[0, :pred_len].set(
        bias.astype(jnp.float32))
    return w_p, b_p, head_nf, pred_len


# --------------------------------------------------------------------------- #
# Forward
# --------------------------------------------------------------------------- #
@functools.partial(jax.jit, static_argnames=("head_nf", "pred_len"))
def forecasting_head(x, w_p, b_p, *, head_nf, pred_len):
    """MOMENT ForecastingHead forward: flatten(-2) -> Linear -> dropout(eval)."""
    *lead, P, D = x.shape
    assert P * D == head_nf, f"head_nf mismatch: {P * D} vs {head_nf}"
    Kp, Np = w_p.shape

    x2 = x.reshape(-1, head_nf)          # flatten(start_dim=-2) + fold leading
    M = x2.shape[0]

    compute_dtype = w_p.dtype
    out_dtype = x.dtype
    cb = jnp.dtype(compute_dtype).itemsize
    ob = jnp.dtype(out_dtype).itemsize

    sub = max(_sublane(compute_dtype), _sublane(out_dtype))
    Mp = _round_up(M, sub)

    if (M, head_nf) == (Mp, Kp) and x.dtype == compute_dtype:
        x_p = x2
    else:
        x_p = jnp.zeros((Mp, Kp), compute_dtype).at[:M, :head_nf].set(
            x2.astype(compute_dtype))

    # ---- generation-aware tile / VMEM budget --------------------------------
    gen = _tpu_generation()
    if gen in ("v5", "v6"):
        # 128 MiB VMEM: grow tiles so each weight DMA is multiple MiB.
        tm_cap, tn_cap, tk_cap = 512, 512, 2048
        vmem_limit = 64 * 1024 * 1024
    else:
        # v7x (64 MiB VMEM per core) or unknown: conservative footprint.
        tm_cap, tn_cap, tk_cap = 256, 256, 1024
        vmem_limit = 32 * 1024 * 1024

    total_bytes = Mp * Kp * cb + Kp * Np * cb + Mp * Np * (ob + 4)
    if total_bytes <= 4 * 1024 * 1024:
        # Whole (padded) problem comfortably fits in VMEM: trivial single-step
        # grid -- per-step pipeline overhead (~0.35 us) dominates tiny shapes.
        tm, tn, tk = Mp, Np, Kp
    else:
        tm = _largest_tile(Mp, sub, tm_cap)
        tn = _largest_tile(Np, 128, tn_cap)
        tk = _largest_tile(Kp, 128, tk_cap)
        if gen == "v7" and (Mp // tm) * (Np // tn) < 2:
            # Guarantee >=2 parallel blocks so both v7x TensorCores get work.
            if Np >= 256:
                tn = 128
            elif Mp // sub >= 2:
                tm = _largest_tile(Mp, sub, max(sub, tm // 2))

    gm, gn, gk = Mp // tm, Np // tn, Kp // tk

    cost = pl.CostEstimate(
        flops=2 * Mp * Np * Kp,
        transcendentals=0,
        # x is re-read once per N tile, W once per M tile.
        bytes_accessed=gn * Mp * Kp * cb + gm * Kp * Np * cb + Mp * Np * ob,
    )

    if gk == 1:
        # Single-K fast path: no accumulator scratch, no pl.when branches.
        grid = (gm, gn)
        in_specs = [
            pl.BlockSpec((tm, Kp), lambda i, j: (i, 0)),
            pl.BlockSpec((Kp, tn), lambda i, j: (0, j)),
            pl.BlockSpec((1, tn), lambda i, j: (0, j)),
        ]
        out_spec = pl.BlockSpec((tm, tn), lambda i, j: (i, j))
        kernel = _fh_kernel_single_k
        scratch = []
        dims = ("parallel", "parallel")
    else:
        grid = (gm, gn, gk)
        in_specs = [
            pl.BlockSpec((tm, tk), lambda i, j, k: (i, k)),
            _weight_spec_multi_k(tk, tn),
            pl.BlockSpec((1, tn), lambda i, j, k: (0, j)),
        ]
        out_spec = pl.BlockSpec((tm, tn), lambda i, j, k: (i, j))
        kernel = _fh_kernel_multi_k
        scratch = [pltpu.VMEM((tm, tn), jnp.float32)]
        dims = ("parallel", "parallel", "arbitrary")

    out = pl.pallas_call(
        kernel,
        out_shape=jax.ShapeDtypeStruct((Mp, Np), out_dtype),
        grid_spec=pltpu.PrefetchScalarGridSpec(
            num_scalar_prefetch=0,
            grid=grid,
            in_specs=in_specs,
            out_specs=out_spec,
            scratch_shapes=scratch,
        ),
        compiler_params=pltpu.CompilerParams(
            dimension_semantics=dims,
            vmem_limit_bytes=vmem_limit,
        ),
        cost_estimate=cost,
    )(x_p, w_p, b_p)

    return out[:M, :pred_len].reshape(*lead, pred_len)


# --------------------------------------------------------------------------- #
# Demo / correctness check
# --------------------------------------------------------------------------- #
if __name__ == "__main__":
    def make_case(key, batch, n_channels, n_patches, d_model, pred_len):
        kx, kw, kb = jax.random.split(key, 3)
        head_nf = n_patches * d_model
        x = jax.random.normal(kx, (batch, n_channels, n_patches, d_model),
                              dtype=jnp.float32)
        # Deterministic nn.Linear-style init, PyTorch layout (pred_len, head_nf)
        bound = 1.0 / (head_nf ** 0.5)
        weight = jax.random.uniform(kw, (pred_len, head_nf),
                                    minval=-bound, maxval=bound,
                                    dtype=jnp.float32)
        bias = jax.random.uniform(kb, (pred_len,),
                                  minval=-bound, maxval=bound,
                                  dtype=jnp.float32)
        return x, weight, bias

    key = jax.random.PRNGKey(0)
    k1, k2 = jax.random.split(key)

    # Case 1: small shapes (batch=2, channels=4, patches=8, d_model=32,
    # pred_len=96) -> whole-problem-in-VMEM single-step fast path.
    x, weight, bias = make_case(k1, 2, 4, 8, 32, 96)
    w_p, b_p, head_nf, pred_len = prepare_head_params(weight, bias)
    y = forecasting_head(x, w_p, b_p, head_nf=head_nf, pred_len=pred_len)
    y = jax.block_until_ready(y)
    y_ref = x.reshape(2, 4, -1) @ weight.T + bias
    assert y.shape == (2, 4, 96)
    assert jnp.allclose(y, y_ref, atol=1e-5, rtol=1e-5), \
        float(jnp.max(jnp.abs(y - y_ref)))

    # Case 2: larger head_nf / pred_len (head_nf=3072, pred_len=336)
    # -> tiled, multi-K-step accumulator path on every TPU generation.
    x2, weight2, bias2 = make_case(k2, 2, 4, 8, 384, 336)
    w_p2, b_p2, head_nf2, pred_len2 = prepare_head_params(weight2, bias2)
    y2 = forecasting_head(x2, w_p2, b_p2, head_nf=head_nf2, pred_len=pred_len2)
    y2 = jax.block_until_ready(y2)
    y2_ref = jnp.einsum("bcf,pf->bcp", x2.reshape(2, 4, -1), weight2,
                        precision=jax.lax.Precision.HIGHEST) + bias2
    assert y2.shape == (2, 4, 336)
    assert jnp.allclose(y2, y2_ref, atol=2e-3, rtol=2e-3), \
        float(jnp.max(jnp.abs(y2 - y2_ref)))

    print("KERNEL_OK")
</pallas_src>

<mosaic_0001>
module attributes {stable_mosaic.version = 11 : i64} {
  func.func @_fh_kernel_single_k(%arg0: i32, %arg1: i32, %arg2: memref<8x256xf32, #tpu.memory_space<vmem>>, %arg3: memref<256x128xf32, #tpu.memory_space<vmem>>, %arg4: memref<1x128xf32, #tpu.memory_space<vmem>>, %arg5: memref<8x128xf32, #tpu.memory_space<vmem>>) attributes {dimension_semantics = [#tpu.dimension_semantics<parallel>, #tpu.dimension_semantics<parallel>], iteration_bounds = array<i64: 1, 1>, scalar_prefetch = 0 : i64, scratch_operands = 0 : i64, tpu.core_type = #tpu.core_type<tc>, window_params = [{transform_indices = @transform_0, window_bounds = array<i64: 8, 256>}, {transform_indices = @transform_1, window_bounds = array<i64: 256, 128>}, {transform_indices = @transform_2, window_bounds = array<i64: 1, 128>}, {transform_indices = @transform_3, window_bounds = array<i64: 8, 128>}]} {
    %c0 = arith.constant 0 : index
    %c0_0 = arith.constant 0 : index
    %0 = vector.load %arg2[%c0, %c0_0] : memref<8x256xf32, #tpu.memory_space<vmem>>, vector<8x256xf32>
    %c0_1 = arith.constant 0 : index
    %c0_2 = arith.constant 0 : index
    %1 = vector.load %arg3[%c0_1, %c0_2] : memref<256x128xf32, #tpu.memory_space<vmem>>, vector<256x128xf32>
    %cst = arith.constant dense<0.000000e+00> : vector<8x128xf32>
    %2 = tpu.matmul %0, %1, %cst {dimension_numbers = #tpu.dot_dimension_numbers<[1], [0], [0], [1], [0, 0, 1, 1], [], []>} : vector<8x256xf32>, vector<256x128xf32>, vector<8x128xf32> -> vector<8x128xf32>
    %c0_3 = arith.constant 0 : index
    %c0_4 = arith.constant 0 : index
    %3 = vector.load %arg4[%c0_3, %c0_4] : memref<1x128xf32, #tpu.memory_space<vmem>>, vector<1x128xf32>
    %4 = vector.broadcast %3 : vector<1x128xf32> to vector<8x128xf32>
    %5 = arith.addf %2, %4 : vector<8x128xf32>
    %c0_5 = arith.constant 0 : index
    %c0_6 = arith.constant 0 : index
    %6 = vector.load %arg5[%c0_5, %c0_6] : memref<8x128xf32, #tpu.memory_space<vmem>>, vector<8x128xf32>
    tpu.vector_store %arg5[%c0_5, %c0_6], %5 {strides = array<i32>} : memref<8x128xf32, #tpu.memory_space<vmem>>, vector<8x128xf32>,
    return
  }
  func.func @transform_0(%arg0: i32, %arg1: i32) -> (i32, i32) {
    %c0_i32 = arith.constant 0 : i32
    %c0_i32_0 = arith.constant 0 : i32
    return %arg0, %c0_i32 : i32, i32
  }
  func.func @transform_1(%arg0: i32, %arg1: i32) -> (i32, i32) {
    %c0_i32 = arith.constant 0 : i32
    %c0_i32_0 = arith.constant 0 : i32
    return %c0_i32, %arg1 : i32, i32
  }
  func.func @transform_2(%arg0: i32, %arg1: i32) -> (i32, i32) {
    %c0_i32 = arith.constant 0 : i32
    %c0_i32_0 = arith.constant 0 : i32
    return %c0_i32, %arg1 : i32, i32
  }
  func.func @transform_3(%arg0: i32, %arg1: i32) -> (i32, i32) {
    %c0_i32 = arith.constant 0 : i32
    return %arg0, %arg1 : i32, i32
  }
}

</mosaic_0001>

<bundles_post_ra>
// kernel: forecasting_head.1
= control target key start
LH: loop header
LB: loop body
LE: loop exit
PB: predicated region body
PF: predicated region fallthrough
CT: control target
= control target key end

     0   :  { %8 = vsyncpa [#allocation3], 0  ;;  %s223_s0 = inlined_call_operand.vmem [shape: f32[8,256], index: 0, kind: input, shape index: {}]   ;;  %s224_s1 = inlined_call_operand.hbm [shape: f32[256,128], index: 1, kind: input, shape index: {}]   ;;  %s225_s2 = inlined_call_operand.vmem [shape: f32[1,128], index: 2, kind: input, shape index: {}]   ;;  %s226_s3 = inlined_call_operand.hbm [shape: f32[8,128], index: 3, kind: output, shape index: {}]  }
   0x1   :  { %9 = vsyncpa [#allocation4], 0  ;;  %s16_s14 = sshll.u32 %s224_s1, 4  ;;  %s184_s15 = smov [#allocation2]   ;;  %s17_s14 = int_to_ptr.hbm [resolvable:$true] %s16_s14 }
   0x2   :  { %s18_s16 = sshll.u32 %s184_s15, 4  ;;  %s185_s17 = smov 128   ;;  %s19_s16 = int_to_ptr.vmem [resolvable:$true] %s18_s16 }
   0x3   :  { %s186_s18 = smov 8  }
   0x4   :  { %24 = dma.hbm_to_vmem [thread:$0]  %s17_s14, 4096, %s19_s16, [#allocation3], %s185_s17, %s185_s17, %s186_s18  }
   0x5   :  { %180 = dma.done.wait [#allocation3], 4096  }
   0x6   :  { %181 = vsyncadd [#allocation3], 4294963200  ;;  %v48_v0 = vld [vmem:[#allocation2 + $0x78] sm:$0xff]  ;;  %v47_v1 = vld [vmem:[#allocation2 + $0x70] sm:$0xff]  ;;  %s187_s24 = smov [#allocation5]   ;;  %s117_s28 = sshll.u32 %s226_s3, 4  ;;  %s118_s28 = int_to_ptr.hbm [resolvable:$true] %s117_s28 }
   0x7   :  { %v64_v2 = vld [vmem:[#allocation2 + $0xf8] sm:$0xff]  ;;  %69 = vmatpush.msra.mxu0 %v48_v0  ;;  %v63_v3 = vld [vmem:[#allocation2 + $0xf0] sm:$0xff]  ;;  %v46_v4 = vld [vmem:[#allocation2 + $0x68] sm:$0xff]  ;;  %s115_s25 = sshll.u32 %s187_s24, 4  ;;  %s116_s25 = int_to_ptr.vmem [resolvable:$true] %s115_s25 }
   0x8   :  { %89 = vmatpush.msra.mxu1 %v64_v2  ;;  %v62_v5 = vld [vmem:[#allocation2 + $0xe8] sm:$0xff]  ;;  %v45_v6 = vld [vmem:[#allocation2 + $0x60] sm:$0xff]  ;;  %v44_v8 = vld [vmem:[#allocation2 + $0x58] sm:$0xff] }
   0x9   :  { %70 = vmatpush.msra.mxu0 %v47_v1  ;;  %v61_v7 = vld [vmem:[#allocation2 + $0xe0] sm:$0xff]  ;;  %v60_v9 = vld [vmem:[#allocation2 + $0xd8] sm:$0xff]  ;;  %v43_v10 = vld [vmem:[#allocation2 + $0x50] sm:$0xff] }
   0xa   :  { %90 = vmatpush.msra.mxu1 %v63_v3  ;;  %v59_v11 = vld [vmem:[#allocation2 + $0xd0] sm:$0xff]  ;;  %v42_v12 = vld [vmem:[#allocation2 + $0x48] sm:$0xff]  ;;  %v41_v14 = vld [vmem:[#allocation2 + $0x40] sm:$0xff] }
   0xb   :  { %71 = vmatpush.msra.mxu0 %v46_v4  ;;  %v58_v13 = vld [vmem:[#allocation2 + $0xc8] sm:$0xff]  ;;  %v57_v15 = vld [vmem:[#allocation2 + $0xc0] sm:$0xff]  ;;  %v40_v16 = vld [vmem:[#allocation2 + $0x38] sm:$0xff] }
   0xc   :  { %91 = vmatpush.msra.mxu1 %v62_v5  ;;  %v56_v17 = vld [vmem:[#allocation2 + $0xb8] sm:$0xff]  ;;  %v39_v18 = vld [vmem:[#allocation2 + $0x30] sm:$0xff]  ;;  %v38_v20 = vld [vmem:[#allocation2 + $0x28] sm:$0xff] }
   0xd   :  { %72 = vmatpush.msra.mxu0 %v45_v6  ;;  %v55_v19 = vld [vmem:[#allocation2 + $0xb0] sm:$0xff]  ;;  %v54_v21 = vld [vmem:[#allocation2 + $0xa8] sm:$0xff]  ;;  %v37_v22 = vld [vmem:[#allocation2 + $0x20] sm:$0xff] }
   0xe   :  { %92 = vmatpush.msra.mxu1 %v61_v7  ;;  %v53_v23 = vld [vmem:[#allocation2 + $0xa0] sm:$0xff]  ;;  %v36_v24 = vld [vmem:[#allocation2 + $0x18] sm:$0xff]  ;;  %v35_v26 = vld [vmem:[#allocation2 + $0x10] sm:$0xff] }
   0xf   :  { %73 = vmatpush.msra.mxu0 %v44_v8  ;;  %v52_v25 = vld [vmem:[#allocation2 + $0x98] sm:$0xff]  ;;  %v51_v27 = vld [vmem:[#allocation2 + $0x90] sm:$0xff]  ;;  %v34_v28 = vld [vmem:[#allocation2 + $0x8] sm:$0xff] }
  0x10   :  { %93 = vmatpush.msra.mxu1 %v60_v9  ;;  %v50_v29 = vld [vmem:[#allocation2 + $0x88] sm:$0xff]  ;;  %v33_v30 = vld [vmem:[#allocation2] sm:$0xff] }
  0x11   :  { %74 = vmatpush.msra.mxu0 %v43_v10  ;;  %v49_v31 = vld [vmem:[#allocation2 + $0x80] sm:$0xff]  ;;  %v32_v33 = vld [vmem:[%s223_s0 + $0x8] sm:$0xff] }
  0x12   :  { %94 = vmatpush.msra.mxu1 %v59_v11  ;;  %v31_v32 = vld [vmem:[%s223_s0] sm:$0xff] }
  0x13   :  { %75 = vmatpush.msra.mxu0 %v42_v12  ;;  %v131_v34 = vld [vmem:[%s225_s2] ss:$0 sm:$0xff] }
  0x14   :  { %95 = vmatpush.msra.mxu1 %v58_v13 }
  0x15   :  { %76 = vmatpush.msra.mxu0 %v41_v14 }
  0x16   :  { %96 = vmatpush.msra.mxu1 %v57_v15 }
  0x17   :  { %77 = vmatpush.msra.mxu0 %v40_v16 }
  0x18   :  { %97 = vmatpush.msra.mxu1 %v56_v17 }
  0x19   :  { %78 = vmatpush.msra.mxu0 %v39_v18 }
  0x1a   :  { %98 = vmatpush.msra.mxu1 %v55_v19 }
  0x1b   :  { %79 = vmatpush.msra.mxu0 %v38_v20 }
  0x1c   :  { %99 = vmatpush.msra.mxu1 %v54_v21 }
  0x1d   :  { %80 = vmatpush.msra.mxu0 %v37_v22 }
  0x1e   :  { %100 = vmatpush.msra.mxu1 %v53_v23 }
  0x1f   :  { %81 = vmatpush.msra.mxu0 %v36_v24 }
  0x20   :  { %101 = vmatpush.msra.mxu1 %v52_v25 }
  0x21   :  { %82 = vmatpush.msra.mxu0 %v35_v26 }
  0x22   :  { %102 = vmatpush.msra.mxu1 %v51_v27 }
  0x23   :  { %83 = vmatpush.msra.mxu0 %v34_v28 }
  0x24   :  { %103 = vmatpush.msra.mxu1 %v50_v29 }
  0x25   :  { %84 = vmatpush.msra.mxu0 %v33_v30 }
  0x26   :  { %104 = vmatpush.msra.mxu1 %v49_v31  ;;  %85 = vmatmul.f32.vlgmr.msra.gmra.mxu0 %v31_v32 }
  0x27   :  { %105 = vmatmul.f32.vlgmr.msra.gmra.mxu1 %v32_v33 }
  0xa3   :  { %v86_v35 = vpop.f32.mrf.mxu0 }
  0xa4   :  { %v106_v36 = vpop.f32.mrf.mxu1  ;;  %v87_v37 = vadd.f32 %v131_v34, %v86_v35 }
  0xa6   :  { %v107_v38 = vadd.f32 %v106_v36, %v87_v37 }
  0xa8   :  { %109 = vst [vmem:[#allocation5] sm:$0xff] %v107_v38 }
  0xa9   :  { %120 = dma.vmem_to_hbm [thread:$0]  %s116_s25, 128, %s118_s28, [#allocation4]  }
  0xaa   :  { %182 = dma.done.wait [#allocation4], 128  }
  0xab   :  { %183 = vsyncadd [#allocation4], 4294967168 }
  0xac   :  { %125 = vsyncpa [#allocation3], 1 }
  0xad   :  { %126 = vsyncpa [#allocation4], 1 }

</bundles_post_ra>
